<compile_context>
chip_gen: v5e
topology: v5e:2x2
jax: 0.10.0
libtpu: 0.0.40
codegen_flags: <defaults>
</compile_context>

<pallas_src>
import functools

import jax
import jax.numpy as jnp
from jax.experimental import pallas as pl
from jax.experimental.pallas import tpu as pltpu

EPS = 1e-5
LANE = 128   # lane width / MXU edge: Cout and K are padded to multiples of this


def _round_up(x, m):
    return (x + m - 1) // m * m


def _row_tile(rows):
    # TM: multiple of 8, capped so per-tile VMEM stays small even on v7x (64 MiB).
    return min(256, _round_up(rows, 8))


# ----------------------------- Pallas kernels ------------------------------ #

def _matmul_stats_kernel(p_ref, w_ref, o_ref, stats_ref, acc_ref):
    """Tiled im2col matmul (bf16 -> f32 acc) + per-row-tile BN partial stats."""
    k = pl.program_id(2)

    @pl.when(k == 0)
    def _():
        acc_ref[...] = jnp.zeros_like(acc_ref)

    acc_ref[...] += jnp.dot(p_ref[...], w_ref[...],
                            preferred_element_type=jnp.float32)

    @pl.when(k == pl.num_programs(2) - 1)
    def _():
        y = acc_ref[...]
        o_ref[...] = y.astype(o_ref.dtype)
        s = jnp.sum(y, axis=0, keepdims=True)        # (1, TN)  per-channel sum
        ss = jnp.sum(y * y, axis=0, keepdims=True)   # (1, TN)  per-channel sumsq
        pad = jnp.zeros((6, y.shape[1]), jnp.float32)
        stats_ref[...] = jnp.concatenate([s, ss, pad], axis=0)[None]  # (1, 8, TN)


def _bn_relu_kernel(y_ref, s_ref, b_ref, o_ref):
    out = y_ref[...] * s_ref[...] + b_ref[...]
    o_ref[...] = jnp.maximum(out, 0.0).astype(o_ref.dtype)


def _bn_add_relu_kernel(y_ref, s_ref, b_ref, r_ref, rs_ref, rb_ref, o_ref):
    out = y_ref[...] * s_ref[...] + b_ref[...]
    out = out + (r_ref[...] * rs_ref[...] + rb_ref[...])   # fused shortcut BN + add
    o_ref[...] = jnp.maximum(out, 0.0).astype(o_ref.dtype)


# ------------------------------ Pallas wrappers ----------------------------- #

def conv_matmul_stats(patches, wmat, true_rows):
    """Tiled conv-as-matmul; returns padded y (f32), per-channel mean/var."""
    rows, kdim = patches.shape
    cout = wmat.shape[1]

    tm = _row_tile(rows)
    tn = LANE
    tk = LANE

    rows_p = _round_up(rows, tm)
    k_p = _round_up(kdim, tk)
    cout_p = _round_up(cout, tn)

    p = jnp.zeros((rows_p, k_p), jnp.bfloat16).at[:rows, :kdim].set(
        patches.astype(jnp.bfloat16))
    w = jnp.zeros((k_p, cout_p), jnp.bfloat16).at[:kdim, :cout].set(
        wmat.astype(jnp.bfloat16))

    mt, nt, kt = rows_p // tm, cout_p // tn, k_p // tk

    flops = 2 * rows_p * k_p * cout_p
    bytes_accessed = (p.size * 2 + w.size * 2
                      + rows_p * cout_p * 4 + mt * 8 * cout_p * 4)

    y, stats = pl.pallas_call(
        _matmul_stats_kernel,
        grid=(mt, nt, kt),
        in_specs=[pl.BlockSpec((tm, tk), lambda i, j, k: (i, k)),
                  pl.BlockSpec((tk, tn), lambda i, j, k: (k, j))],
        out_specs=[pl.BlockSpec((tm, tn), lambda i, j, k: (i, j)),
                   pl.BlockSpec((1, 8, tn), lambda i, j, k: (i, 0, j))],
        out_shape=[jax.ShapeDtypeStruct((rows_p, cout_p), jnp.float32),
                   jax.ShapeDtypeStruct((mt, 8, cout_p), jnp.float32)],
        scratch_shapes=[pltpu.VMEM((tm, tn), jnp.float32)],
        compiler_params=pltpu.CompilerParams(
            dimension_semantics=("parallel", "parallel", "arbitrary")),
        cost_estimate=pl.CostEstimate(flops=flops, transcendentals=0,
                                      bytes_accessed=bytes_accessed),
    )(p, w)

    # Cross-tile reduction of the streamed partial statistics (tiny).
    total = jnp.sum(stats, axis=0)                   # (8, cout_p)
    mean = total[0] / true_rows                      # padded rows are zero -> unbiased
    var = total[1] / true_rows - mean * mean         # biased variance (PyTorch BN fwd)
    return y, mean, var, cout_p


def bn_affine(y, scale, bias, residual=None, r_scale=None, r_bias=None):
    """Tiled per-channel affine (folded BN) [+ residual affine] + ReLU."""
    rows_p, cout_p = y.shape
    tm = _row_tile(rows_p)
    tn = LANE
    mt, nt = rows_p // tm, cout_p // tn

    row_spec = pl.BlockSpec((tm, tn), lambda i, j: (i, j))
    vec_spec = pl.BlockSpec((1, tn), lambda i, j: (0, j))

    if residual is None:
        kernel = _bn_relu_kernel
        args = (y, scale, bias)
        specs = [row_spec, vec_spec, vec_spec]
    else:
        kernel = _bn_add_relu_kernel
        args = (y, scale, bias, residual, r_scale, r_bias)
        specs = [row_spec, vec_spec, vec_spec, row_spec, vec_spec, vec_spec]

    return pl.pallas_call(
        kernel,
        grid=(mt, nt),
        in_specs=specs,
        out_specs=row_spec,
        out_shape=jax.ShapeDtypeStruct((rows_p, cout_p), jnp.float32),
        compiler_params=pltpu.CompilerParams(
            dimension_semantics=("parallel", "parallel")),
    )(*args)


# ------------------------------- JAX glue ---------------------------------- #

def im2col(x_nhwc, ksize, stride, padding):
    """x: (N,H,W,C) -> patches (N*Ho*Wo, ksize*ksize*C), patch order (kh,kw,C)."""
    n, h, w, c = x_nhwc.shape
    xp = jnp.pad(x_nhwc, ((0, 0), (padding, padding), (padding, padding), (0, 0)))
    ho = (h + 2 * padding - ksize) // stride + 1
    wo = (w + 2 * padding - ksize) // stride + 1
    cols = []
    for dh in range(ksize):
        for dw in range(ksize):
            cols.append(xp[:, dh:dh + stride * ho:stride, dw:dw + stride * wo:stride, :])
    patches = jnp.concatenate(cols, axis=-1)
    return patches.reshape(n * ho * wo, ksize * ksize * c), (n, ho, wo)


def torch_conv_weight_to_mat(w):
    """PyTorch conv weight (Cout, Cin, kh, kw) -> matmul matrix (kh*kw*Cin, Cout)."""
    cout = w.shape[0]
    return jnp.transpose(w, (2, 3, 1, 0)).reshape(-1, cout)


def affine_params(gamma, beta, mean, var, cout, cout_p):
    """Fold BN batch stats + gamma/beta into per-channel scale/bias (f32, padded)."""
    g = jnp.zeros((cout_p,), jnp.float32).at[:cout].set(gamma.reshape(-1))
    b = jnp.zeros((cout_p,), jnp.float32).at[:cout].set(beta.reshape(-1))
    scale = g * jax.lax.rsqrt(var + EPS)   # padded channels: gamma=0 -> scale=0
    bias = b - mean * scale
    return scale[None, :], bias[None, :]


def init_basic_block_params(key, in_planes, planes, stride):
    ks = jax.random.split(key, 3)
    scale1 = 1.0 / jnp.sqrt(in_planes * 9.0)
    scale2 = 1.0 / jnp.sqrt(planes * 9.0)
    params = {
        "w1": jax.random.normal(ks[0], (planes, in_planes, 3, 3), jnp.float32) * scale1,
        "g1": jnp.ones((1, planes), jnp.float32),
        "b1": jnp.zeros((1, planes), jnp.float32),
        "w2": jax.random.normal(ks[1], (planes, planes, 3, 3), jnp.float32) * scale2,
        "g2": jnp.ones((1, planes), jnp.float32),
        "b2": jnp.zeros((1, planes), jnp.float32),
    }
    if stride != 1 or in_planes != planes:
        scale_sc = 1.0 / jnp.sqrt(float(in_planes))
        params["wsc"] = jax.random.normal(ks[2], (planes, in_planes, 1, 1),
                                          jnp.float32) * scale_sc
        params["gsc"] = jnp.ones((1, planes), jnp.float32)
        params["bsc"] = jnp.zeros((1, planes), jnp.float32)
    return params


def basic_block_forward(x_nchw, params, stride):
    x = jnp.transpose(x_nchw, (0, 2, 3, 1)).astype(jnp.float32)  # NCHW -> NHWC
    n, h, w, cin = x.shape
    planes = params["w1"].shape[0]

    # conv1 (3x3, stride, pad=1): tiled matmul + streamed BN stats, then BN+ReLU.
    p1, (n_, ho, wo) = im2col(x, 3, stride, 1)
    rows = n_ * ho * wo
    y1, mean1, var1, cout_p = conv_matmul_stats(
        p1, torch_conv_weight_to_mat(params["w1"]), rows)
    s1, b1 = affine_params(params["g1"], params["b1"], mean1, var1, planes, cout_p)
    out1 = bn_affine(y1, s1, b1)
    out1_img = out1[:rows, :planes].reshape(n_, ho, wo, planes)

    # shortcut branch: raw 1x1 conv (matmul) now, its BN folded into the final kernel.
    if stride != 1 or cin != planes:
        psc, _ = im2col(x, 1, stride, 0)
        residual, mean_sc, var_sc, _ = conv_matmul_stats(
            psc, torch_conv_weight_to_mat(params["wsc"]), rows)
        ssc, bsc = affine_params(params["gsc"], params["bsc"],
                                 mean_sc, var_sc, planes, cout_p)
    else:
        rows_p = y1.shape[0]
        residual = jnp.zeros((rows_p, cout_p), jnp.float32).at[:rows, :cin].set(
            x.reshape(rows, cin))
        ssc = jnp.ones((1, cout_p), jnp.float32)
        bsc = jnp.zeros((1, cout_p), jnp.float32)

    # conv2 (3x3, stride 1, pad=1) + BN2 + shortcut-BN + add + ReLU (one fused epilogue).
    p2, _ = im2col(out1_img, 3, 1, 1)
    y2, mean2, var2, _ = conv_matmul_stats(
        p2, torch_conv_weight_to_mat(params["w2"]), rows)
    s2, b2 = affine_params(params["g2"], params["b2"], mean2, var2, planes, cout_p)
    out = bn_affine(y2, s2, b2, residual=residual, r_scale=ssc, r_bias=bsc)

    out_img = out[:rows, :planes].reshape(n_, ho, wo, planes)
    return jnp.transpose(out_img, (0, 3, 1, 2))  # back to NCHW


# --------------------------------- main ------------------------------------ #

if __name__ == "__main__":
    N, IN_PLANES, PLANES, H, W, STRIDE = 2, 4, 8, 16, 16, 2

    x = jax.random.normal(jax.random.PRNGKey(0), (N, IN_PLANES, H, W), jnp.float32)
    params = init_basic_block_params(jax.random.PRNGKey(42), IN_PLANES, PLANES, STRIDE)

    fwd = jax.jit(functools.partial(basic_block_forward, stride=STRIDE))
    y = jax.block_until_ready(fwd(x, params))

    assert y.shape == (N, PLANES, H // STRIDE, W // STRIDE), y.shape
    assert bool(jnp.all(jnp.isfinite(y)))
    assert bool(jnp.all(y >= 0.0))  # final ReLU
    print("KERNEL_OK")
</pallas_src>

<mosaic_0001>
module attributes {stable_mosaic.version = 11 : i64} {
  func.func @_matmul_stats_kernel(%arg0: i32, %arg1: i32, %arg2: i32, %arg3: memref<128x128xbf16, #tpu.memory_space<vmem>>, %arg4: memref<128x128xbf16, #tpu.memory_space<vmem>>, %arg5: memref<128x128xf32, #tpu.memory_space<vmem>>, %arg6: memref<1x8x128xf32, #tpu.memory_space<vmem>>, %arg7: memref<128x128xf32, #tpu.memory_space<vmem>>) attributes {dimension_semantics = [#tpu.dimension_semantics<parallel>, #tpu.dimension_semantics<parallel>, #tpu.dimension_semantics<arbitrary>], iteration_bounds = array<i64: 1, 1, 1>, scalar_prefetch = 0 : i64, scratch_operands = 1 : i64, tpu.core_type = #tpu.core_type<tc>, window_params = [{transform_indices = @transform_0, window_bounds = array<i64: 128, 128>}, {transform_indices = @transform_1, window_bounds = array<i64: 128, 128>}, {transform_indices = @transform_2, window_bounds = array<i64: 128, 128>}, {transform_indices = @transform_3, window_bounds = array<i64: 1, 8, 128>}]} {
    %c0_i32 = arith.constant 0 : i32
    %0 = arith.cmpi eq, %arg2, %c0_i32 : i32
    %1 = arith.extui %0 : i1 to i32
    %c0_i32_0 = arith.constant 0 : i32
    %2 = arith.cmpi ne, %1, %c0_i32_0 : i32
    scf.if %2 {
      %cst_10 = arith.constant 0.000000e+00 : f32
      %12 = vector.broadcast %cst_10 : f32 to vector<128x128xf32>
      %c0_11 = arith.constant 0 : index
      %c0_12 = arith.constant 0 : index
      %13 = vector.load %arg7[%c0_11, %c0_12] : memref<128x128xf32, #tpu.memory_space<vmem>>, vector<128x128xf32>
      tpu.vector_store %arg7[%c0_11, %c0_12], %12 {strides = array<i32>} : memref<128x128xf32, #tpu.memory_space<vmem>>, vector<128x128xf32>,
    } else {
    }
    %c0 = arith.constant 0 : index
    %c0_1 = arith.constant 0 : index
    %3 = vector.load %arg7[%c0, %c0_1] : memref<128x128xf32, #tpu.memory_space<vmem>>, vector<128x128xf32>
    %c0_2 = arith.constant 0 : index
    %c0_3 = arith.constant 0 : index
    %4 = vector.load %arg3[%c0_2, %c0_3] : memref<128x128xbf16, #tpu.memory_space<vmem>>, vector<128x128xbf16>
    %c0_4 = arith.constant 0 : index
    %c0_5 = arith.constant 0 : index
    %5 = vector.load %arg4[%c0_4, %c0_5] : memref<128x128xbf16, #tpu.memory_space<vmem>>, vector<128x128xbf16>
    %cst = arith.constant dense<0.000000e+00> : vector<128x128xf32>
    %6 = tpu.matmul %4, %5, %cst {dimension_numbers = #tpu.dot_dimension_numbers<[1], [0], [0], [1], [0, 0, 1, 1], [], []>} : vector<128x128xbf16>, vector<128x128xbf16>, vector<128x128xf32> -> vector<128x128xf32>
    %7 = arith.addf %3, %6 : vector<128x128xf32>
    %c0_6 = arith.constant 0 : index
    %c0_7 = arith.constant 0 : index
    %8 = vector.load %arg7[%c0_6, %c0_7] : memref<128x128xf32, #tpu.memory_space<vmem>>, vector<128x128xf32>
    tpu.vector_store %arg7[%c0_6, %c0_7], %7 {strides = array<i32>} : memref<128x128xf32, #tpu.memory_space<vmem>>, vector<128x128xf32>,
    %c0_i32_8 = arith.constant 0 : i32
    %9 = arith.cmpi eq, %arg2, %c0_i32_8 : i32
    %10 = arith.extui %9 : i1 to i32
    %c0_i32_9 = arith.constant 0 : i32
    %11 = arith.cmpi ne, %10, %c0_i32_9 : i32
    scf.if %11 {
      %c0_10 = arith.constant 0 : index
      %c0_11 = arith.constant 0 : index
      %12 = vector.load %arg7[%c0_10, %c0_11] : memref<128x128xf32, #tpu.memory_space<vmem>>, vector<128x128xf32>
      %c0_12 = arith.constant 0 : index
      %c0_13 = arith.constant 0 : index
      %13 = vector.load %arg5[%c0_12, %c0_13] : memref<128x128xf32, #tpu.memory_space<vmem>>, vector<128x128xf32>
      tpu.vector_store %arg5[%c0_12, %c0_13], %12 {strides = array<i32>} : memref<128x128xf32, #tpu.memory_space<vmem>>, vector<128x128xf32>,
      %cst_14 = arith.constant dense<0.000000e+00> : vector<128xf32>
      %14 = vector.multi_reduction <add>, %12, %cst_14 [0] : vector<128x128xf32> to vector<128xf32>
      %15 = vector.shape_cast %14 : vector<128xf32> to vector<1x128xf32>
      %16 = arith.mulf %12, %12 : vector<128x128xf32>
      %cst_15 = arith.constant dense<0.000000e+00> : vector<128xf32>
      %17 = vector.multi_reduction <add>, %16, %cst_15 [0] : vector<128x128xf32> to vector<128xf32>
      %18 = vector.shape_cast %17 : vector<128xf32> to vector<1x128xf32>
      %cst_16 = arith.constant 0.000000e+00 : f32
      %19 = vector.broadcast %cst_16 : f32 to vector<6x128xf32>
      %20 = tpu.concatenate %15, %18, %19 in 0 : vector<1x128xf32>, vector<1x128xf32>, vector<6x128xf32> -> vector<8x128xf32>
      %21 = vector.shape_cast %20 : vector<8x128xf32> to vector<1x8x128xf32>
      %c0_17 = arith.constant 0 : index
      %c0_18 = arith.constant 0 : index
      %c0_19 = arith.constant 0 : index
      %22 = vector.load %arg6[%c0_17, %c0_18, %c0_19] : memref<1x8x128xf32, #tpu.memory_space<vmem>>, vector<1x8x128xf32>
      tpu.vector_store %arg6[%c0_17, %c0_18, %c0_19], %21 {strides = array<i32>} : memref<1x8x128xf32, #tpu.memory_space<vmem>>, vector<1x8x128xf32>,
    } else {
    }
    return
  }
  func.func @transform_0(%arg0: i32, %arg1: i32, %arg2: i32) -> (i32, i32) {
    %c0_i32 = arith.constant 0 : i32
    return %arg0, %arg2 : i32, i32
  }
  func.func @transform_1(%arg0: i32, %arg1: i32, %arg2: i32) -> (i32, i32) {
    %c0_i32 = arith.constant 0 : i32
    return %arg2, %arg1 : i32, i32
  }
  func.func @transform_2(%arg0: i32, %arg1: i32, %arg2: i32) -> (i32, i32) {
    %c0_i32 = arith.constant 0 : i32
    return %arg0, %arg1 : i32, i32
  }
  func.func @transform_3(%arg0: i32, %arg1: i32, %arg2: i32) -> (i32, i32, i32) {
    %c0_i32 = arith.constant 0 : i32
    %c0_i32_0 = arith.constant 0 : i32
    return %arg0, %c0_i32, %arg1 : i32, i32, i32
  }
}

module attributes {stable_mosaic.version = 11 : i64} {
  func.func @_bn_relu_kernel(%arg0: i32, %arg1: i32, %arg2: memref<128x128xf32, #tpu.memory_space<vmem>>, %arg3: memref<1x128xf32, #tpu.memory_space<vmem>>, %arg4: memref<1x128xf32, #tpu.memory_space<vmem>>, %arg5: memref<128x128xf32, #tpu.memory_space<vmem>>) attributes {dimension_semantics = [#tpu.dimension_semantics<parallel>, #tpu.dimension_semantics<parallel>], iteration_bounds = array<i64: 1, 1>, scalar_prefetch = 0 : i64, scratch_operands = 0 : i64, tpu.core_type = #tpu.core_type<tc>, window_params = [{transform_indices = @transform_0, window_bounds = array<i64: 128, 128>}, {transform_indices = @transform_1, window_bounds = array<i64: 1, 128>}, {transform_indices = @transform_2, window_bounds = array<i64: 1, 128>}, {transform_indices = @transform_3, window_bounds = array<i64: 128, 128>}]} {
    %c0 = arith.constant 0 : index
    %c0_0 = arith.constant 0 : index
    %0 = vector.load %arg2[%c0, %c0_0] : memref<128x128xf32, #tpu.memory_space<vmem>>, vector<128x128xf32>
    %c0_1 = arith.constant 0 : index
    %c0_2 = arith.constant 0 : index
    %1 = vector.load %arg3[%c0_1, %c0_2] : memref<1x128xf32, #tpu.memory_space<vmem>>, vector<1x128xf32>
    %2 = vector.broadcast %1 : vector<1x128xf32> to vector<128x128xf32>
    %3 = arith.mulf %0, %2 : vector<128x128xf32>
    %c0_3 = arith.constant 0 : index
    %c0_4 = arith.constant 0 : index
    %4 = vector.load %arg4[%c0_3, %c0_4] : memref<1x128xf32, #tpu.memory_space<vmem>>, vector<1x128xf32>
    %5 = vector.broadcast %4 : vector<1x128xf32> to vector<128x128xf32>
    %6 = arith.addf %3, %5 : vector<128x128xf32>
    %cst = arith.constant 0.000000e+00 : f32
    %7 = vector.broadcast %cst : f32 to vector<128x128xf32>
    %8 = arith.maximumf %6, %7 : vector<128x128xf32>
    %c0_5 = arith.constant 0 : index
    %c0_6 = arith.constant 0 : index
    %9 = vector.load %arg5[%c0_5, %c0_6] : memref<128x128xf32, #tpu.memory_space<vmem>>, vector<128x128xf32>
    tpu.vector_store %arg5[%c0_5, %c0_6], %8 {strides = array<i32>} : memref<128x128xf32, #tpu.memory_space<vmem>>, vector<128x128xf32>,
    return
  }
  func.func @transform_0(%arg0: i32, %arg1: i32) -> (i32, i32) {
    %c0_i32 = arith.constant 0 : i32
    return %arg0, %arg1 : i32, i32
  }
  func.func @transform_1(%arg0: i32, %arg1: i32) -> (i32, i32) {
    %c0_i32 = arith.constant 0 : i32
    %c0_i32_0 = arith.constant 0 : i32
    return %c0_i32, %arg1 : i32, i32
  }
  func.func @transform_2(%arg0: i32, %arg1: i32) -> (i32, i32) {
    %c0_i32 = arith.constant 0 : i32
    %c0_i32_0 = arith.constant 0 : i32
    return %c0_i32, %arg1 : i32, i32
  }
  func.func @transform_3(%arg0: i32, %arg1: i32) -> (i32, i32) {
    %c0_i32 = arith.constant 0 : i32
    return %arg0, %arg1 : i32, i32
  }
}

module attributes {stable_mosaic.version = 11 : i64} {
  func.func @_bn_add_relu_kernel(%arg0: i32, %arg1: i32, %arg2: memref<128x128xf32, #tpu.memory_space<vmem>>, %arg3: memref<1x128xf32, #tpu.memory_space<vmem>>, %arg4: memref<1x128xf32, #tpu.memory_space<vmem>>, %arg5: memref<128x128xf32, #tpu.memory_space<vmem>>, %arg6: memref<1x128xf32, #tpu.memory_space<vmem>>, %arg7: memref<1x128xf32, #tpu.memory_space<vmem>>, %arg8: memref<128x128xf32, #tpu.memory_space<vmem>>) attributes {dimension_semantics = [#tpu.dimension_semantics<parallel>, #tpu.dimension_semantics<parallel>], iteration_bounds = array<i64: 1, 1>, scalar_prefetch = 0 : i64, scratch_operands = 0 : i64, tpu.core_type = #tpu.core_type<tc>, window_params = [{transform_indices = @transform_0, window_bounds = array<i64: 128, 128>}, {transform_indices = @transform_1, window_bounds = array<i64: 1, 128>}, {transform_indices = @transform_2, window_bounds = array<i64: 1, 128>}, {transform_indices = @transform_3, window_bounds = array<i64: 128, 128>}, {transform_indices = @transform_4, window_bounds = array<i64: 1, 128>}, {transform_indices = @transform_5, window_bounds = array<i64: 1, 128>}, {transform_indices = @transform_6, window_bounds = array<i64: 128, 128>}]} {
    %c0 = arith.constant 0 : index
    %c0_0 = arith.constant 0 : index
    %0 = vector.load %arg2[%c0, %c0_0] : memref<128x128xf32, #tpu.memory_space<vmem>>, vector<128x128xf32>
    %c0_1 = arith.constant 0 : index
    %c0_2 = arith.constant 0 : index
    %1 = vector.load %arg3[%c0_1, %c0_2] : memref<1x128xf32, #tpu.memory_space<vmem>>, vector<1x128xf32>
    %2 = vector.broadcast %1 : vector<1x128xf32> to vector<128x128xf32>
    %3 = arith.mulf %0, %2 : vector<128x128xf32>
    %c0_3 = arith.constant 0 : index
    %c0_4 = arith.constant 0 : index
    %4 = vector.load %arg4[%c0_3, %c0_4] : memref<1x128xf32, #tpu.memory_space<vmem>>, vector<1x128xf32>
    %5 = vector.broadcast %4 : vector<1x128xf32> to vector<128x128xf32>
    %6 = arith.addf %3, %5 : vector<128x128xf32>
    %c0_5 = arith.constant 0 : index
    %c0_6 = arith.constant 0 : index
    %7 = vector.load %arg5[%c0_5, %c0_6] : memref<128x128xf32, #tpu.memory_space<vmem>>, vector<128x128xf32>
    %c0_7 = arith.constant 0 : index
    %c0_8 = arith.constant 0 : index
    %8 = vector.load %arg6[%c0_7, %c0_8] : memref<1x128xf32, #tpu.memory_space<vmem>>, vector<1x128xf32>
    %9 = vector.broadcast %8 : vector<1x128xf32> to vector<128x128xf32>
    %10 = arith.mulf %7, %9 : vector<128x128xf32>
    %c0_9 = arith.constant 0 : index
    %c0_10 = arith.constant 0 : index
    %11 = vector.load %arg7[%c0_9, %c0_10] : memref<1x128xf32, #tpu.memory_space<vmem>>, vector<1x128xf32>
    %12 = vector.broadcast %11 : vector<1x128xf32> to vector<128x128xf32>
    %13 = arith.addf %10, %12 : vector<128x128xf32>
    %14 = arith.addf %6, %13 : vector<128x128xf32>
    %cst = arith.constant 0.000000e+00 : f32
    %15 = vector.broadcast %cst : f32 to vector<128x128xf32>
    %16 = arith.maximumf %14, %15 : vector<128x128xf32>
    %c0_11 = arith.constant 0 : index
    %c0_12 = arith.constant 0 : index
    %17 = vector.load %arg8[%c0_11, %c0_12] : memref<128x128xf32, #tpu.memory_space<vmem>>, vector<128x128xf32>
    tpu.vector_store %arg8[%c0_11, %c0_12], %16 {strides = array<i32>} : memref<128x128xf32, #tpu.memory_space<vmem>>, vector<128x128xf32>,
    return
  }
  func.func @transform_0(%arg0: i32, %arg1: i32) -> (i32, i32) {
    %c0_i32 = arith.constant 0 : i32
    return %arg0, %arg1 : i32, i32
  }
  func.func @transform_1(%arg0: i32, %arg1: i32) -> (i32, i32) {
    %c0_i32 = arith.constant 0 : i32
    %c0_i32_0 = arith.constant 0 : i32
    return %c0_i32, %arg1 : i32, i32
  }
  func.func @transform_2(%arg0: i32, %arg1: i32) -> (i32, i32) {
    %c0_i32 = arith.constant 0 : i32
    %c0_i32_0 = arith.constant 0 : i32
    return %c0_i32, %arg1 : i32, i32
  }
  func.func @transform_3(%arg0: i32, %arg1: i32) -> (i32, i32) {
    %c0_i32 = arith.constant 0 : i32
    return %arg0, %arg1 : i32, i32
  }
  func.func @transform_4(%arg0: i32, %arg1: i32) -> (i32, i32) {
    %c0_i32 = arith.constant 0 : i32
    %c0_i32_0 = arith.constant 0 : i32
    return %c0_i32, %arg1 : i32, i32
  }
  func.func @transform_5(%arg0: i32, %arg1: i32) -> (i32, i32) {
    %c0_i32 = arith.constant 0 : i32
    %c0_i32_0 = arith.constant 0 : i32
    return %c0_i32, %arg1 : i32, i32
  }
  func.func @transform_6(%arg0: i32, %arg1: i32) -> (i32, i32) {
    %c0_i32 = arith.constant 0 : i32
    return %arg0, %arg1 : i32, i32
  }
}

</mosaic_0001>

<bundles_post_ra>
// kernel: basic_block_forward.6
= control target key start
LH: loop header
LB: loop body
LE: loop exit
PB: predicated region body
PF: predicated region fallthrough
CT: control target
= control target key end

     0   :  { %s248_s0 = inlined_call_operand.vmem [shape: f32[128,128], index: 0, kind: input, shape index: {}]   ;;  %s249_s1 = inlined_call_operand.vmem [shape: f32[1,128], index: 1, kind: input, shape index: {}]   ;;  %s250_s2 = inlined_call_operand.vmem [shape: f32[1,128], index: 2, kind: input, shape index: {}]   ;;  %s251_s3 = inlined_call_operand.vmem [shape: f32[128,128], index: 3, kind: output, shape index: {}]  }
   0x1   :  { %v14_v0 = vld [vmem:[%s248_s0] sm:$0xff]  ;;  %v15_v3 = vld [vmem:[%s248_s0 + $0x8] sm:$0xff]  ;;  %v16_v6 = vld [vmem:[%s248_s0 + $0x10] sm:$0xff] }
   0x2   :  { %v106_v1 = vld [vmem:[%s249_s1] ss:$0 sm:$0xff]  ;;  %v17_v7 = vld [vmem:[%s248_s0 + $0x18] sm:$0xff]  ;;  %v19_v12 = vld [vmem:[%s248_s0 + $0x28] sm:$0xff] }
   0x3   :  { %v137_v2 = vld [vmem:[%s250_s2] ss:$0 sm:$0xff]  ;;  %v34_v4 = vmul.f32 %v106_v1, %v14_v0  ;;  %v35_v5 = vmul.f32 %v106_v1, %v15_v3  ;;  %v36_v9 = vmul.f32 %v106_v1, %v16_v6  ;;  %v37_v10 = vmul.f32 %v106_v1, %v17_v7  ;;  %v20_v13 = vld [vmem:[%s248_s0 + $0x30] sm:$0xff]  ;;  %v21_v14 = vld [vmem:[%s248_s0 + $0x38] sm:$0xff] }
   0x4   :  { %v18_v8 = vld [vmem:[%s248_s0 + $0x20] sm:$0xff]  ;;  %v39_v17 = vmul.f32 %v106_v1, %v19_v12  ;;  %v40_v18 = vmul.f32 %v106_v1, %v20_v13  ;;  %v41_v22 = vmul.f32 %v106_v1, %v21_v14  ;;  %v23_v24 = vld [vmem:[%s248_s0 + $0x48] sm:$0xff]  ;;  %v24_v29 = vld [vmem:[%s248_s0 + $0x50] sm:$0xff] }
   0x5   :  { %v38_v11 = vmul.f32 %v106_v1, %v18_v8  ;;  %v54_v15 = vadd.f32 %v137_v2, %v34_v4  ;;  %v55_v16 = vadd.f32 %v137_v2, %v35_v5  ;;  %v56_v19 = vadd.f32 %v137_v2, %v36_v9  ;;  %v22_v23 = vld [vmem:[%s248_s0 + $0x40] sm:$0xff]  ;;  %v25_v30 = vld [vmem:[%s248_s0 + $0x58] sm:$0xff]  ;;  %v27_v35 = vld [vmem:[%s248_s0 + $0x68] sm:$0xff] }
   0x6   :  { %v57_v20 = vadd.f32 %v137_v2, %v37_v10  ;;  %v59_v27 = vadd.f32 %v137_v2, %v39_v17  ;;  %v60_v28 = vadd.f32 %v137_v2, %v40_v18  ;;  %v26_v31 = vld [vmem:[%s248_s0 + $0x60] sm:$0xff]  ;;  %v61_v34 = vadd.f32 %v137_v2, %v41_v22  ;;  %v28_v36 = vld [vmem:[%s248_s0 + $0x70] sm:$0xff]  ;;  %v29_v41 = vld [vmem:[%s248_s0 + $0x78] sm:$0xff] }
   0x7   :  { %v58_v21 = vadd.f32 %v137_v2, %v38_v11  ;;  %v70_v25 = vmax.f32 %v54_v15, 0.0  ;;  %v71_v26 = vmax.f32 %v55_v16, 0.0  ;;  %v72_v32 = vmax.f32 %v56_v19, 0.0 }
   0x8   :  { %v73_v33 = vmax.f32 %v57_v20, 0.0  ;;  %v75_v38 = vmax.f32 %v59_v27, 0.0  ;;  %v42_v39 = vmul.f32 %v106_v1, %v22_v23  ;;  %v43_v40 = vmul.f32 %v106_v1, %v23_v24 }
   0x9   :  { %86 = vst [vmem:[%s251_s3] sm:$0xff] %v70_v25  ;;  %v74_v37 = vmax.f32 %v58_v21, 0.0  ;;  %v76_v42 = vmax.f32 %v60_v28, 0.0  ;;  %v44_v43 = vmul.f32 %v106_v1, %v24_v29  ;;  %v45_v44 = vmul.f32 %v106_v1, %v25_v30 }
   0xa   :  { %87 = vst [vmem:[%s251_s3 + $0x8] sm:$0xff] %v71_v26  ;;  %v46_v45 = vmul.f32 %v106_v1, %v26_v31  ;;  %v62_v46 = vadd.f32 %v137_v2, %v42_v39  ;;  %v63_v47 = vadd.f32 %v137_v2, %v43_v40  ;;  %v47_v48 = vmul.f32 %v106_v1, %v27_v35 }
   0xb   :  { %88 = vst [vmem:[%s251_s3 + $0x10] sm:$0xff] %v72_v32  ;;  %v48_v49 = vmul.f32 %v106_v1, %v28_v36  ;;  %v77_v50 = vmax.f32 %v61_v34, 0.0  ;;  %v64_v51 = vadd.f32 %v137_v2, %v44_v43  ;;  %v65_v52 = vadd.f32 %v137_v2, %v45_v44 }
   0xc   :  { %89 = vst [vmem:[%s251_s3 + $0x18] sm:$0xff] %v73_v33  ;;  %v49_v53 = vmul.f32 %v106_v1, %v29_v41  ;;  %v78_v54 = vmax.f32 %v62_v46, 0.0  ;;  %v66_v55 = vadd.f32 %v137_v2, %v46_v45  ;;  %v79_v56 = vmax.f32 %v63_v47, 0.0 }
   0xd   :  { %90 = vst [vmem:[%s251_s3 + $0x20] sm:$0xff] %v74_v37  ;;  %v67_v57 = vadd.f32 %v137_v2, %v47_v48  ;;  %v80_v58 = vmax.f32 %v64_v51, 0.0  ;;  %v68_v59 = vadd.f32 %v137_v2, %v48_v49  ;;  %v81_v60 = vmax.f32 %v65_v52, 0.0 }
   0xe   :  { %91 = vst [vmem:[%s251_s3 + $0x28] sm:$0xff] %v75_v38  ;;  %v69_v61 = vadd.f32 %v137_v2, %v49_v53  ;;  %v82_v62 = vmax.f32 %v66_v55, 0.0 }
   0xf   :  { %92 = vst [vmem:[%s251_s3 + $0x30] sm:$0xff] %v76_v42  ;;  %v83_v63 = vmax.f32 %v67_v57, 0.0  ;;  %v84_v0 = vmax.f32 %v68_v59, 0.0 }
  0x10   :  { %93 = vst [vmem:[%s251_s3 + $0x38] sm:$0xff] %v77_v50  ;;  %v85_v1 = vmax.f32 %v69_v61, 0.0 }
  0x11   :  { %94 = vst [vmem:[%s251_s3 + $0x40] sm:$0xff] %v78_v54 }
  0x12   :  { %95 = vst [vmem:[%s251_s3 + $0x48] sm:$0xff] %v79_v56 }
  0x13   :  { %96 = vst [vmem:[%s251_s3 + $0x50] sm:$0xff] %v80_v58 }
  0x14   :  { %97 = vst [vmem:[%s251_s3 + $0x58] sm:$0xff] %v81_v60 }
  0x15   :  { %98 = vst [vmem:[%s251_s3 + $0x60] sm:$0xff] %v82_v62 }
  0x16   :  { %99 = vst [vmem:[%s251_s3 + $0x68] sm:$0xff] %v83_v63 }
  0x17   :  { %100 = vst [vmem:[%s251_s3 + $0x70] sm:$0xff] %v84_v0 }
  0x18   :  { %101 = vst [vmem:[%s251_s3 + $0x78] sm:$0xff] %v85_v1 }

// kernel: basic_block_forward.5
= control target key start
LH: loop header
LB: loop body
LE: loop exit
PB: predicated region body
PF: predicated region fallthrough
CT: control target
= control target key end

     0   :  { %vm351_vm0 = vcmask 1040384   ;;  %vm353_vm1 = vcmask 1041408   ;;  %s587_s1 = inlined_call_operand.vmem [shape: bf16[128,128], index: 1, kind: input, shape index: {}]   ;;  %s588_s0 = inlined_call_operand.vmem [shape: bf16[128,128], index: 0, kind: input, shape index: {}]   ;;  %s589_s2 = inlined_call_operand.vmem [shape: f32[128,128], index: 2, kind: output, shape index: {0}]   ;;  %s590_s3 = inlined_call_operand.vmem [shape: f32[1,8,128], index: 3, kind: output, shape index: {1}]  }
   0x1   :  { %v443_v0 = vld [vmem:[%s587_s1 + $0x38] sm:$0xff]  ;;  %v442_v1 = vld [vmem:[%s587_s1 + $0x30] sm:$0xff]  ;;  %v441_v2 = vld [vmem:[%s587_s1 + $0x28] sm:$0xff] }
   0x2   :  { %177 = vmatpush.bf16.msra.mxu0 %v443_v0  ;;  %444 = vmatpush.bf16.msra.mxu1 %v443_v0  ;;  %v440_v3 = vld [vmem:[%s587_s1 + $0x20] sm:$0xff]  ;;  %v439_v4 = vld [vmem:[%s587_s1 + $0x18] sm:$0xff]  ;;  %v438_v5 = vld [vmem:[%s587_s1 + $0x10] sm:$0xff] }
   0x3   :  { %445 = vmatpush.bf16.msra.mxu2 %v443_v0  ;;  %446 = vmatpush.bf16.msra.mxu3 %v443_v0  ;;  %v437_v6 = vld [vmem:[%s587_s1 + $0x8] sm:$0xff]  ;;  %v436_v7 = vld [vmem:[%s587_s1] sm:$0xff]  ;;  %v430_v9 = vld [vmem:[%s588_s0 + $0x10] sm:$0xff] }
   0x4   :  { %v428_v8 = vld [vmem:[%s588_s0] sm:$0xff]  ;;  %v434_v11 = vld [vmem:[%s588_s0 + $0x30] sm:$0xff]  ;;  %v429_v12 = vld [vmem:[%s588_s0 + $0x8] sm:$0xff] }
   0x5   :  { %v432_v10 = vld [vmem:[%s588_s0 + $0x20] sm:$0xff]  ;;  %v431_v13 = vld [vmem:[%s588_s0 + $0x18] sm:$0xff]  ;;  %v433_v14 = vld [vmem:[%s588_s0 + $0x28] sm:$0xff] }
   0x6   :  { %178 = vmatpush.bf16.msra.mxu0 %v442_v1  ;;  %447 = vmatpush.bf16.msra.mxu1 %v442_v1  ;;  %v435_v15 = vld [vmem:[%s588_s0 + $0x38] sm:$0xff] }
   0x7   :  { %448 = vmatpush.bf16.msra.mxu2 %v442_v1  ;;  %449 = vmatpush.bf16.msra.mxu3 %v442_v1 }
   0xa   :  { %179 = vmatpush.bf16.msra.mxu0 %v441_v2  ;;  %450 = vmatpush.bf16.msra.mxu1 %v441_v2 }
   0xb   :  { %451 = vmatpush.bf16.msra.mxu2 %v441_v2  ;;  %452 = vmatpush.bf16.msra.mxu3 %v441_v2 }
   0xe   :  { %180 = vmatpush.bf16.msra.mxu0 %v440_v3  ;;  %453 = vmatpush.bf16.msra.mxu1 %v440_v3 }
   0xf   :  { %454 = vmatpush.bf16.msra.mxu2 %v440_v3  ;;  %455 = vmatpush.bf16.msra.mxu3 %v440_v3 }
  0x12   :  { %181 = vmatpush.bf16.msra.mxu0 %v439_v4  ;;  %456 = vmatpush.bf16.msra.mxu1 %v439_v4 }
  0x13   :  { %457 = vmatpush.bf16.msra.mxu2 %v439_v4  ;;  %458 = vmatpush.bf16.msra.mxu3 %v439_v4 }
  0x16   :  { %182 = vmatpush.bf16.msra.mxu0 %v438_v5  ;;  %459 = vmatpush.bf16.msra.mxu1 %v438_v5 }
  0x17   :  { %460 = vmatpush.bf16.msra.mxu2 %v438_v5  ;;  %461 = vmatpush.bf16.msra.mxu3 %v438_v5 }
  0x1a   :  { %183 = vmatpush.bf16.msra.mxu0 %v437_v6  ;;  %462 = vmatpush.bf16.msra.mxu1 %v437_v6 }
  0x1b   :  { %463 = vmatpush.bf16.msra.mxu2 %v437_v6  ;;  %464 = vmatpush.bf16.msra.mxu3 %v437_v6 }
  0x1e   :  { %184 = vmatpush.bf16.msra.mxu0 %v436_v7  ;;  %465 = vmatpush.bf16.msra.mxu1 %v436_v7 }
  0x1f   :  { %466 = vmatpush.bf16.msra.mxu2 %v436_v7  ;;  %467 = vmatpush.bf16.msra.mxu3 %v436_v7 }
  0x21   :  { %185 = vmatmul.bf16.vlgmr.msra.gmra.mxu0 %v428_v8  ;;  %195 = vmatmul.bf16.vlgmr.msra.gmra.mxu1 %v430_v9 }
  0x22   :  { %205 = vmatmul.bf16.vlgmr.msra.gmra.mxu2 %v432_v10  ;;  %215 = vmatmul.bf16.vlgmr.msra.gmra.mxu3 %v434_v11 }
  0x31   :  { %190 = vmatmul.bf16.gmra.mxu0 %v429_v12  ;;  %200 = vmatmul.bf16.gmra.mxu1 %v431_v13 }
  0x32   :  { %210 = vmatmul.bf16.gmra.mxu2 %v433_v14  ;;  %220 = vmatmul.bf16.gmra.mxu3 %v435_v15 }
  0x9e   :  { %v186_v16 = vpop.f32.mrf.mxu0  ;;  %v196_v17 = vpop.f32.mrf.mxu1 }
  0x9f   :  { %277 = vst [vmem:[%s589_s2] sm:$0xff] %v186_v16  ;;  %v314_v27 = vmul.f32 %v186_v16, %v186_v16  ;;  %v318_v39 = vmul.f32 %v196_v17, %v196_v17 }
  0xa0   :  { %281 = vst [vmem:[%s589_s2 + $0x20] sm:$0xff] %v196_v17 }
  0xa5   :  { %v206_v18 = vpop.f32.mrf.mxu2  ;;  %v216_v19 = vpop.f32.mrf.mxu3 }
  0xa6   :  { %v188_v20 = vpop.f32.mrf.mxu0  ;;  %v198_v21 = vpop.f32.mrf.mxu1  ;;  %285 = vst [vmem:[%s589_s2 + $0x40] sm:$0xff] %v206_v18  ;;  %v322_v53 = vmul.f32 %v206_v18, %v206_v18  ;;  %v326_v1 = vmul.f32 %v216_v19, %v216_v19 }
  0xa7   :  { %278 = vst [vmem:[%s589_s2 + $0x8] sm:$0xff] %v188_v20  ;;  %v315_v26 = vmul.f32 %v188_v20, %v188_v20  ;;  %v293_v28 = vadd.f32 %v188_v20, %v186_v16  ;;  %v319_v42 = vmul.f32 %v198_v21, %v198_v21 }
  0xa8   :  { %282 = vst [vmem:[%s589_s2 + $0x28] sm:$0xff] %v198_v21 }
  0xa9   :  { %289 = vst [vmem:[%s589_s2 + $0x60] sm:$0xff] %v216_v19  ;;  %v330_v30 = vadd.f32 %v315_v26, %v314_v27 }
  0xad   :  { %v208_v22 = vpop.f32.mrf.mxu2  ;;  %v218_v23 = vpop.f32.mrf.mxu3 }
  0xae   :  { %v191_v24 = vpop.f32.mrf.mxu0  ;;  %v201_v25 = vpop.f32.mrf.mxu1  ;;  %286 = vst [vmem:[%s589_s2 + $0x48] sm:$0xff] %v208_v22  ;;  %v323_v56 = vmul.f32 %v208_v22, %v208_v22  ;;  %v327_v4 = vmul.f32 %v218_v23, %v218_v23 }
  0xaf   :  { %279 = vst [vmem:[%s589_s2 + $0x10] sm:$0xff] %v191_v24  ;;  %v316_v29 = vmul.f32 %v191_v24, %v191_v24  ;;  %v294_v31 = vadd.f32 %v293_v28, %v191_v24  ;;  %v320_v45 = vmul.f32 %v201_v25, %v201_v25 }
  0xb0   :  { %283 = vst [vmem:[%s589_s2 + $0x30] sm:$0xff] %v201_v25 }
  0xb1   :  { %290 = vst [vmem:[%s589_s2 + $0x68] sm:$0xff] %v218_v23  ;;  %v331_v36 = vadd.f32 %v330_v30, %v316_v29 }
  0xb5   :  { %v211_v32 = vpop.f32.mrf.mxu2  ;;  %v221_v33 = vpop.f32.mrf.mxu3 }
  0xb6   :  { %v193_v34 = vpop.f32.mrf.mxu0  ;;  %v203_v35 = vpop.f32.mrf.mxu1  ;;  %287 = vst [vmem:[%s589_s2 + $0x50] sm:$0xff] %v211_v32  ;;  %v324_v60 = vmul.f32 %v211_v32, %v211_v32  ;;  %v328_v8 = vmul.f32 %v221_v33, %v221_v33 }
  0xb7   :  { %280 = vst [vmem:[%s589_s2 + $0x18] sm:$0xff] %v193_v34  ;;  %v295_v37 = vadd.f32 %v294_v31, %v193_v34  ;;  %v317_v38 = vmul.f32 %v193_v34, %v193_v34  ;;  %v321_v51 = vmul.f32 %v203_v35, %v203_v35 }
  0xb8   :  { %284 = vst [vmem:[%s589_s2 + $0x38] sm:$0xff] %v203_v35 }
  0xb9   :  { %v296_v40 = vadd.f32 %v295_v37, %v196_v17  ;;  %v332_v41 = vadd.f32 %v331_v36, %v317_v38  ;;  %291 = vst [vmem:[%s589_s2 + $0x70] sm:$0xff] %v221_v33 }
  0xbb   :  { %v333_v43 = vadd.f32 %v332_v41, %v318_v39  ;;  %v297_v44 = vadd.f32 %v296_v40, %v198_v21 }
  0xbd   :  { %v298_v46 = vadd.f32 %v297_v44, %v201_v25  ;;  %v334_v47 = vadd.f32 %v333_v43, %v319_v42  ;;  %v213_v48 = vpop.f32.mrf.mxu2  ;;  %v223_v49 = vpop.f32.mrf.mxu3 }
  0xbe   :  { %288 = vst [vmem:[%s589_s2 + $0x58] sm:$0xff] %v213_v48  ;;  %v325_v0 = vmul.f32 %v213_v48, %v213_v48  ;;  %v329_v12 = vmul.f32 %v223_v49, %v223_v49 }
  0xbf   :  { %v299_v50 = vadd.f32 %v298_v46, %v203_v35  ;;  %v335_v52 = vadd.f32 %v334_v47, %v320_v45  ;;  %292 = vst [vmem:[%s589_s2 + $0x78] sm:$0xff] %v223_v49 }
  0xc1   :  { %v300_v54 = vadd.f32 %v299_v50, %v206_v18  ;;  %v336_v55 = vadd.f32 %v335_v52, %v321_v51 }
  0xc3   :  { %v337_v57 = vadd.f32 %v336_v55, %v322_v53  ;;  %v301_v58 = vadd.f32 %v300_v54, %v208_v22 }
  0xc5   :  { %v302_v59 = vadd.f32 %v301_v58, %v211_v32  ;;  %v338_v61 = vadd.f32 %v337_v57, %v323_v56 }
  0xc7   :  { %v339_v62 = vadd.f32 %v338_v61, %v324_v60  ;;  %v303_v63 = vadd.f32 %v302_v59, %v213_v48 }
  0xc9   :  { %v304_v2 = vadd.f32 %v303_v63, %v216_v19  ;;  %v340_v3 = vadd.f32 %v339_v62, %v325_v0 }
  0xcb   :  { %v341_v5 = vadd.f32 %v340_v3, %v326_v1  ;;  %v305_v6 = vadd.f32 %v304_v2, %v218_v23 }
  0xcd   :  { %v306_v7 = vadd.f32 %v305_v6, %v221_v33  ;;  %v342_v9 = vadd.f32 %v341_v5, %v327_v4 }
  0xcf   :  { %v343_v10 = vadd.f32 %v342_v9, %v328_v8  ;;  %v307_v11 = vadd.f32 %v306_v7, %v223_v49 }
  0xd1   :  { %v308_v13 = vrot.slane %v307_v11, 4  ;;  %v344_v14 = vadd.f32 %v343_v10, %v329_v12 }
  0xd3   :  { %v309_v15 = vadd.f32 %v308_v13, %v307_v11  ;;  %v345_v16 = vrot.slane %v344_v14, 4 }
  0xd5   :  { %v310_v17 = vrot.slane %v309_v15, 2  ;;  %v346_v18 = vadd.f32 %v345_v16, %v344_v14 }
  0xd7   :  { %v311_v20 = vadd.f32 %v310_v17, %v309_v15  ;;  %v347_v21 = vrot.slane %v346_v18, 2 }
  0xd9   :  { %v312_v22 = vrot.slane %v311_v20, 1  ;;  %v348_v19 = vadd.f32 %v347_v21, %v346_v18 }
  0xdb   :  { %v349_v24 = vrot.slane %v348_v19, 1  ;;  %v313_v25 = vadd.f32 %v312_v22, %v311_v20 }
  0xdd   :  { %v350_v23 = vadd.f32 %v349_v24, %v348_v19 }
  0xdf   :  { %v352_v26 = vsel %vm351_vm0, %v313_v25, %v350_v23 }
  0xe0   :  { %v354_v27 = vsel %vm353_vm1, %v352_v26, 0.0 }
  0xe1   :  { %355 = vst [vmem:[%s590_s3] sm:$0xff] %v354_v27 }

// kernel: basic_block_forward.9
= control target key start
LH: loop header
LB: loop body
LE: loop exit
PB: predicated region body
PF: predicated region fallthrough
CT: control target
= control target key end

     0   :  { %s454_s0 = inlined_call_operand.vmem [shape: f32[128,128], index: 0, kind: input, shape index: {}]   ;;  %s455_s1 = inlined_call_operand.vmem [shape: f32[1,128], index: 1, kind: input, shape index: {}]   ;;  %s456_s2 = inlined_call_operand.vmem [shape: f32[1,128], index: 2, kind: input, shape index: {}]   ;;  %s457_s3 = inlined_call_operand.vmem [shape: f32[128,128], index: 3, kind: input, shape index: {}]   ;;  %s458_s4 = inlined_call_operand.vmem [shape: f32[1,128], index: 4, kind: input, shape index: {}]   ;;  %s459_s5 = inlined_call_operand.vmem [shape: f32[1,128], index: 5, kind: input, shape index: {}]   ;;  %s460_s6 = inlined_call_operand.vmem [shape: f32[128,128], index: 6, kind: output, shape index: {}]  }
   0x1   :  { %v23_v0 = vld [vmem:[%s454_s0] sm:$0xff]  ;;  %v24_v7 = vld [vmem:[%s454_s0 + $0x8] sm:$0xff]  ;;  %v25_v13 = vld [vmem:[%s454_s0 + $0x10] sm:$0xff] }
   0x2   :  { %v232_v1 = vld [vmem:[%s455_s1] ss:$0 sm:$0xff]  ;;  %v80_v8 = vld [vmem:[%s457_s3 + $0x8] sm:$0xff]  ;;  %v81_v14 = vld [vmem:[%s457_s3 + $0x10] sm:$0xff] }
   0x3   :  { %v237_v2 = vld [vmem:[%s456_s2] ss:$0 sm:$0xff]  ;;  %v43_v4 = vmul.f32 %v232_v1, %v23_v0  ;;  %v44_v11 = vmul.f32 %v232_v1, %v24_v7  ;;  %v26_v15 = vld [vmem:[%s454_s0 + $0x18] sm:$0xff]  ;;  %v45_v16 = vmul.f32 %v232_v1, %v25_v13  ;;  %v28_v26 = vld [vmem:[%s454_s0 + $0x28] sm:$0xff] }
   0x4   :  { %v79_v3 = vld [vmem:[%s457_s3] sm:$0xff]  ;;  %v46_v18 = vmul.f32 %v232_v1, %v26_v15  ;;  %v82_v19 = vld [vmem:[%s457_s3 + $0x18] sm:$0xff]  ;;  %v84_v27 = vld [vmem:[%s457_s3 + $0x28] sm:$0xff]  ;;  %v48_v39 = vmul.f32 %v232_v1, %v28_v26 }
   0x5   :  { %v246_v5 = vld [vmem:[%s458_s4] ss:$0 sm:$0xff]  ;;  %v63_v9 = vadd.f32 %v237_v2, %v43_v4  ;;  %v64_v23 = vadd.f32 %v237_v2, %v44_v11  ;;  %v65_v28 = vadd.f32 %v237_v2, %v45_v16  ;;  %v29_v36 = vld [vmem:[%s454_s0 + $0x30] sm:$0xff]  ;;  %v30_v42 = vld [vmem:[%s454_s0 + $0x38] sm:$0xff] }
   0x6   :  { %v251_v6 = vld [vmem:[%s459_s5] ss:$0 sm:$0xff]  ;;  %v99_v10 = vmul.f32 %v246_v5, %v79_v3  ;;  %v100_v12 = vmul.f32 %v246_v5, %v80_v8  ;;  %v101_v17 = vmul.f32 %v246_v5, %v81_v14  ;;  %v102_v25 = vmul.f32 %v246_v5, %v82_v19  ;;  %v85_v41 = vld [vmem:[%s457_s3 + $0x30] sm:$0xff]  ;;  %v86_v47 = vld [vmem:[%s457_s3 + $0x38] sm:$0xff] }
   0x7   :  { %v27_v20 = vld [vmem:[%s454_s0 + $0x20] sm:$0xff]  ;;  %v66_v30 = vadd.f32 %v237_v2, %v46_v18  ;;  %v104_v40 = vmul.f32 %v246_v5, %v84_v27  ;;  %v68_v50 = vadd.f32 %v237_v2, %v48_v39  ;;  %v49_v52 = vmul.f32 %v232_v1, %v29_v36  ;;  %v32_v58 = vld [vmem:[%s454_s0 + $0x48] sm:$0xff]  ;;  %v33_v0 = vld [vmem:[%s454_s0 + $0x50] sm:$0xff] }
   0x8   :  { %v83_v21 = vld [vmem:[%s457_s3 + $0x20] sm:$0xff]  ;;  %v119_v22 = vadd.f32 %v251_v6, %v99_v10  ;;  %v120_v24 = vadd.f32 %v251_v6, %v100_v12  ;;  %v121_v29 = vadd.f32 %v251_v6, %v101_v17  ;;  %v47_v31 = vmul.f32 %v232_v1, %v27_v20  ;;  %v88_v63 = vld [vmem:[%s457_s3 + $0x48] sm:$0xff]  ;;  %v34_v10 = vld [vmem:[%s454_s0 + $0x58] sm:$0xff] }
   0x9   :  { %v122_v34 = vadd.f32 %v251_v6, %v102_v25  ;;  %v103_v35 = vmul.f32 %v246_v5, %v83_v21  ;;  %v31_v48 = vld [vmem:[%s454_s0 + $0x40] sm:$0xff]  ;;  %v124_v51 = vadd.f32 %v251_v6, %v104_v40  ;;  %v105_v56 = vmul.f32 %v246_v5, %v85_v41  ;;  %v90_v19 = vld [vmem:[%s457_s3 + $0x58] sm:$0xff]  ;;  %v37_v36 = vld [vmem:[%s454_s0 + $0x70] sm:$0xff] }
   0xa   :  { %v135_v32 = vadd.f32 %v119_v22, %v63_v9  ;;  %v136_v33 = vadd.f32 %v120_v24, %v64_v23  ;;  %v137_v37 = vadd.f32 %v121_v29, %v65_v28  ;;  %v67_v38 = vadd.f32 %v237_v2, %v47_v31  ;;  %v87_v53 = vld [vmem:[%s457_s3 + $0x40] sm:$0xff]  ;;  %v89_v9 = vld [vmem:[%s457_s3 + $0x50] sm:$0xff]  ;;  %v92_v31 = vld [vmem:[%s457_s3 + $0x68] sm:$0xff] }
   0xb   :  { %v138_v45 = vadd.f32 %v122_v34, %v66_v30  ;;  %v123_v46 = vadd.f32 %v251_v6, %v103_v35  ;;  %v50_v57 = vmul.f32 %v232_v1, %v30_v42  ;;  %v140_v59 = vadd.f32 %v124_v51, %v68_v50  ;;  %v35_v24 = vld [vmem:[%s454_s0 + $0x60] sm:$0xff]  ;;  %v36_v30 = vld [vmem:[%s454_s0 + $0x68] sm:$0xff]  ;;  %v94_v51 = vld [vmem:[%s457_s3 + $0x78] sm:$0xff] }
   0xc   :  { %v151_v43 = vmax.f32 %v135_v32, 0.0  ;;  %v152_v44 = vmax.f32 %v136_v33, 0.0  ;;  %v153_v49 = vmax.f32 %v137_v37, 0.0  ;;  %v69_v60 = vadd.f32 %v237_v2, %v49_v52  ;;  %v91_v25 = vld [vmem:[%s457_s3 + $0x60] sm:$0xff] }
   0xd   :  { %v154_v54 = vmax.f32 %v138_v45, 0.0  ;;  %v139_v55 = vadd.f32 %v123_v46, %v67_v38  ;;  %v106_v61 = vmul.f32 %v246_v5, %v86_v47  ;;  %v51_v62 = vmul.f32 %v232_v1, %v31_v48  ;;  %v93_v45 = vld [vmem:[%s457_s3 + $0x70] sm:$0xff]  ;;  %v38_v46 = vld [vmem:[%s454_s0 + $0x78] sm:$0xff] }
   0xe   :  { %167 = vst [vmem:[%s460_s6] sm:$0xff] %v151_v43  ;;  %v125_v4 = vadd.f32 %v251_v6, %v105_v56  ;;  %v70_v7 = vadd.f32 %v237_v2, %v50_v57  ;;  %v107_v8 = vmul.f32 %v246_v5, %v87_v53  ;;  %v156_v11 = vmax.f32 %v140_v59, 0.0 }
   0xf   :  { %168 = vst [vmem:[%s460_s6 + $0x8] sm:$0xff] %v152_v44  ;;  %v155_v3 = vmax.f32 %v139_v55, 0.0  ;;  %v126_v12 = vadd.f32 %v251_v6, %v106_v61  ;;  %v71_v13 = vadd.f32 %v237_v2, %v51_v62  ;;  %v52_v14 = vmul.f32 %v232_v1, %v32_v58 }
  0x10   :  { %169 = vst [vmem:[%s460_s6 + $0x10] sm:$0xff] %v153_v49  ;;  %v141_v15 = vadd.f32 %v125_v4, %v69_v60  ;;  %v127_v16 = vadd.f32 %v251_v6, %v107_v8  ;;  %v108_v17 = vmul.f32 %v246_v5, %v88_v63  ;;  %v53_v18 = vmul.f32 %v232_v1, %v33_v0 }
  0x11   :  { %170 = vst [vmem:[%s460_s6 + $0x18] sm:$0xff] %v154_v54  ;;  %v142_v20 = vadd.f32 %v126_v12, %v70_v7  ;;  %v72_v21 = vadd.f32 %v237_v2, %v52_v14  ;;  %v109_v22 = vmul.f32 %v246_v5, %v89_v9  ;;  %v54_v23 = vmul.f32 %v232_v1, %v34_v10 }
  0x12   :  { %171 = vst [vmem:[%s460_s6 + $0x20] sm:$0xff] %v155_v3  ;;  %v157_v26 = vmax.f32 %v141_v15, 0.0  ;;  %v143_v27 = vadd.f32 %v127_v16, %v71_v13  ;;  %v128_v28 = vadd.f32 %v251_v6, %v108_v17  ;;  %v73_v29 = vadd.f32 %v237_v2, %v53_v18 }
  0x13   :  { %172 = vst [vmem:[%s460_s6 + $0x28] sm:$0xff] %v156_v11  ;;  %v158_v32 = vmax.f32 %v142_v20, 0.0  ;;  %v129_v33 = vadd.f32 %v251_v6, %v109_v22  ;;  %v74_v34 = vadd.f32 %v237_v2, %v54_v23  ;;  %v110_v35 = vmul.f32 %v246_v5, %v90_v19 }
  0x14   :  { %173 = vst [vmem:[%s460_s6 + $0x30] sm:$0xff] %v157_v26  ;;  %v159_v37 = vmax.f32 %v143_v27, 0.0  ;;  %v144_v38 = vadd.f32 %v128_v28, %v72_v21  ;;  %v55_v39 = vmul.f32 %v232_v1, %v35_v24  ;;  %v111_v40 = vmul.f32 %v246_v5, %v91_v25 }
  0x15   :  { %174 = vst [vmem:[%s460_s6 + $0x38] sm:$0xff] %v158_v32  ;;  %v145_v41 = vadd.f32 %v129_v33, %v73_v29  ;;  %v130_v42 = vadd.f32 %v251_v6, %v110_v35  ;;  %v56_v43 = vmul.f32 %v232_v1, %v36_v30  ;;  %v112_v44 = vmul.f32 %v246_v5, %v92_v31 }
  0x16   :  { %175 = vst [vmem:[%s460_s6 + $0x40] sm:$0xff] %v159_v37  ;;  %v160_v47 = vmax.f32 %v144_v38, 0.0  ;;  %v75_v48 = vadd.f32 %v237_v2, %v55_v39  ;;  %v131_v49 = vadd.f32 %v251_v6, %v111_v40  ;;  %v57_v50 = vmul.f32 %v232_v1, %v37_v36 }
  0x17   :  { %v161_v52 = vmax.f32 %v145_v41, 0.0  ;;  %v146_v53 = vadd.f32 %v130_v42, %v74_v34  ;;  %v76_v54 = vadd.f32 %v237_v2, %v56_v43  ;;  %v132_v55 = vadd.f32 %v251_v6, %v112_v44 }
  0x18   :  { %176 = vst [vmem:[%s460_s6 + $0x48] sm:$0xff] %v160_v47  ;;  %v147_v56 = vadd.f32 %v131_v49, %v75_v48  ;;  %v77_v57 = vadd.f32 %v237_v2, %v57_v50  ;;  %v113_v58 = vmul.f32 %v246_v5, %v93_v45  ;;  %v58_v59 = vmul.f32 %v232_v1, %v38_v46 }
  0x19   :  { %177 = vst [vmem:[%s460_s6 + $0x50] sm:$0xff] %v161_v52  ;;  %v162_v60 = vmax.f32 %v146_v53, 0.0  ;;  %v148_v61 = vadd.f32 %v132_v55, %v76_v54  ;;  %v114_v62 = vmul.f32 %v246_v5, %v94_v51 }
  0x1a   :  { %v163_v63 = vmax.f32 %v147_v56, 0.0  ;;  %v133_v0 = vadd.f32 %v251_v6, %v113_v58  ;;  %v78_v3 = vadd.f32 %v237_v2, %v58_v59 }
  0x1b   :  { %178 = vst [vmem:[%s460_s6 + $0x58] sm:$0xff] %v162_v60  ;;  %v164_v4 = vmax.f32 %v148_v61, 0.0  ;;  %v134_v1 = vadd.f32 %v251_v6, %v114_v62 }
  0x1c   :  { %179 = vst [vmem:[%s460_s6 + $0x60] sm:$0xff] %v163_v63  ;;  %v149_v7 = vadd.f32 %v133_v0, %v77_v57 }
  0x1d   :  { %180 = vst [vmem:[%s460_s6 + $0x68] sm:$0xff] %v164_v4  ;;  %v150_v5 = vadd.f32 %v134_v1, %v78_v3 }
  0x1e   :  { %v165_v8 = vmax.f32 %v149_v7, 0.0 }
  0x1f   :  { %v166_v9 = vmax.f32 %v150_v5, 0.0 }
  0x20   :  { %181 = vst [vmem:[%s460_s6 + $0x70] sm:$0xff] %v165_v8 }
  0x21   :  { %182 = vst [vmem:[%s460_s6 + $0x78] sm:$0xff] %v166_v9 }

</bundles_post_ra>
